<compile_context>
chip_gen: v7x
topology: tpu7x:2x2x1
jax: 0.10.0
libtpu: 0.0.40
codegen_flags: <defaults>
</compile_context>

<pallas_src>
import jax
import jax.numpy as jnp
from jax.experimental import pallas as pl
from jax.experimental.pallas import tpu as pltpu

_LANE = 128
_SUBLANE = 8


def _round_up(n, m):
    return ((n + m - 1) // m) * m


def _vmem_capacity_bytes():
    """Physical VMEM per TensorCore (fallback: 64 MiB, the v7x minimum)."""
    try:
        info = pltpu.get_tpu_info()
        cap = getattr(info, "vmem_capacity_bytes", None)
        if cap:
            return int(cap)
    except Exception:
        pass
    return 64 * 1024 * 1024


def _cores_per_chip():
    """2 TensorCores per device on v4/v5p/v7x (megacore), else 1."""
    try:
        kind = jax.devices()[0].device_kind.lower()
    except Exception:
        return 1
    return 2 if ("v7" in kind or "v4" in kind or "v5p" in kind) else 1


def value_net_kernel(x_ref, w1_ref, b1_ref, w2_ref, b2_ref, w3_ref, b3_ref, o_ref):
    # fc1 + relu: cast x to the MXU dtype in-kernel (VPU) — no wrapper-side pad/cast pass.
    x = x_ref[...].astype(w1_ref.dtype)
    h1 = jnp.dot(x, w1_ref[...], preferred_element_type=jnp.float32)
    h1 = jnp.maximum(h1 + b1_ref[...], 0.0)
    # fc2 + relu
    h2 = jnp.dot(h1.astype(w2_ref.dtype), w2_ref[...], preferred_element_type=jnp.float32)
    h2 = jnp.maximum(h2 + b2_ref[...], 0.0)
    # fc3 (value head, out dim 1): VPU multiply + cross-lane reduction with w3 kept as a
    # (1, hidden) f32 row (avoids a 1-lane-wide MXU matmul and its push/drain tail).
    v = jnp.sum(h2 * w3_ref[...], axis=-1, keepdims=True) + b3_ref[...]  # (tile_b, 1) f32
    # Compact lane-dense store: relayout (tile_b, 1) -> (1, tile_b) (batch on lanes) and
    # write the (1, 1, tile_b) output block; the wrapper just flattens/reshapes.
    o_ref[...] = jnp.transpose(v).reshape(o_ref.shape).astype(o_ref.dtype)


def init_params(key, input_size, hidden_size):
    """Deterministic init matching nn.Linear shapes (weights stored pre-transposed as (in, out))."""
    k1, k2, k3, k4, k5, k6 = jax.random.split(key, 6)
    w1 = jax.random.normal(k1, (input_size, hidden_size), jnp.float32) * 0.1
    b1 = jax.random.normal(k2, (1, hidden_size), jnp.float32) * 0.1
    w2 = jax.random.normal(k3, (hidden_size, hidden_size), jnp.float32) * 0.1
    b2 = jax.random.normal(k4, (1, hidden_size), jnp.float32) * 0.1
    w3 = jax.random.normal(k5, (hidden_size, 1), jnp.float32) * 0.1
    b3 = jax.random.normal(k6, (1, 1), jnp.float32) * 0.1
    return (w1, b1, w2, b2, w3, b3)


def prepare_params(params, *, compute_dtype=jnp.bfloat16):
    """One-time param prep: zero-pad the hidden dim up to a multiple of 128 (lane width),
    keep W1's input dim unpadded (the kernel uses a full-extent block there), reshape the
    value head to a (1, hidden) row, cast MXU weights to `compute_dtype`.  Biases and the
    value-head row stay f32.  Zero padding is exact: padded biases are 0, so ReLU keeps
    padded columns at 0 and the padded w3 entries contribute nothing."""
    w1, b1, w2, b2, w3, b3 = params
    in_size, hidden = w1.shape
    hid_p = _round_up(hidden, _LANE)

    def pad2(a, rows, cols):
        return jnp.pad(a, ((0, rows - a.shape[0]), (0, cols - a.shape[1])))

    return dict(
        w1=pad2(w1, in_size, hid_p).astype(compute_dtype),
        b1=pad2(jnp.reshape(b1, (1, hidden)), 1, hid_p).astype(jnp.float32),
        w2=pad2(w2, hid_p, hid_p).astype(compute_dtype),
        b2=pad2(jnp.reshape(b2, (1, hidden)), 1, hid_p).astype(jnp.float32),
        w3=pad2(jnp.reshape(w3, (hidden, 1)).T, 1, hid_p).astype(jnp.float32),  # (1, hid_p)
        b3=jnp.asarray(b3, jnp.float32).reshape(1, 1),
        in_size=in_size, hid_p=hid_p, compute_dtype=compute_dtype,
    )


def _default_tile_b(B, cores):
    if B <= _SUBLANE:
        return B
    if cores >= 2:
        # Megacore (v4/v5p/v7x): make sure both TensorCores get work, and >=2 steps each
        # for large batches so the x DMA overlaps compute within a core.
        if B <= 128:
            return B
        if B <= 256:
            return _round_up(pl.cdiv(B, 2), _SUBLANE)          # 2 steps (1 per core)
        return _round_up(min(512, pl.cdiv(B, 4)), _SUBLANE)    # >=4 steps, <=512 rows
    # Single-TC (v5e/v6e): biggest tile that pipelines well; ~2 steps for large B.
    if B <= 256:
        return B
    return _round_up(min(1024, pl.cdiv(B, 2)), _SUBLANE)


def _vmem_estimate(tile_b, in_size, hid_p, w_bytes, x_elem_bytes):
    """Rough VMEM bytes: resident single-buffered weights + double-buffered x/out tiles
    + live f32 activations (h1/h2)."""
    weight_bytes = (in_size * hid_p + hid_p * hid_p) * w_bytes + (3 * hid_p + _LANE) * 4
    x_bytes = 2 * tile_b * _round_up(in_size, _LANE) * x_elem_bytes
    out_bytes = 2 * _SUBLANE * _round_up(tile_b, _LANE) * 4
    act_bytes = 2 * tile_b * hid_p * 4
    return weight_bytes, weight_bytes + x_bytes + out_bytes + act_bytes


def simple_value_network(x, prepared, *, tile_b=None):
    """Forward pass of SimpleValueNetwork. Accepts (..., input_size); returns shape (...)."""
    in_size = prepared["in_size"]
    hid_p = prepared["hid_p"]
    cdt = prepared["compute_dtype"]
    w1, b1, w2, b2, w3, b3 = (prepared[k] for k in ("w1", "b1", "w2", "b2", "w3", "b3"))

    lead = x.shape[:-1]
    assert x.shape[-1] == in_size, (x.shape, in_size)
    x2d = x.reshape(-1, in_size)          # no pad, no cast: kernel casts right before fc1
    B = x2d.shape[0]

    cores = _cores_per_chip()
    if tile_b is None:
        tile_b = _default_tile_b(B, cores)
    tile_b = min(tile_b, B)
    if tile_b != B and tile_b % _SUBLANE != 0:
        raise ValueError(f"tile_b={tile_b} must be a multiple of {_SUBLANE} or equal to B={B}")

    # --- Per-generation VMEM budgeting ---------------------------------------------------
    cap = _vmem_capacity_bytes()
    budget = int(cap * 0.85)
    w_bytes = jnp.dtype(cdt).itemsize
    x_elem_bytes = jnp.dtype(x2d.dtype).itemsize
    weight_bytes, est = _vmem_estimate(tile_b, in_size, hid_p, w_bytes, x_elem_bytes)
    if weight_bytes > int(0.75 * cap):
        # TODO(synk): for very large hidden sizes, add a hidden-dim "arbitrary" grid axis
        # (K/N tiling of W1/W2 with an f32 VMEM accumulator) instead of resident weights.
        raise ValueError(
            f"hidden weights ({weight_bytes} B) too large for resident-weight kernel "
            f"(VMEM capacity {cap} B)")
    while est > budget and tile_b > _SUBLANE:
        tile_b = max(_SUBLANE, _round_up(tile_b // 2, _SUBLANE))
        weight_bytes, est = _vmem_estimate(tile_b, in_size, hid_p, w_bytes, x_elem_bytes)
    # Always set the scoped limit (v5e default is only 16 MiB), capped below physical VMEM.
    vmem_limit = min(budget, max(int(est * 1.5), 16 * 1024 * 1024))

    num_tiles = pl.cdiv(B, tile_b)
    single = pl.Buffered(1)  # constant-index blocks: fetched once, no double buffering

    out = pl.pallas_call(
        value_net_kernel,
        # Compact output: (num_tiles, 1, tile_b) f32, batch on the lane axis per tile.
        out_shape=jax.ShapeDtypeStruct((num_tiles, 1, tile_b), jnp.float32),
        grid_spec=pltpu.PrefetchScalarGridSpec(
            num_scalar_prefetch=0,
            grid=(num_tiles,),
            in_specs=[
                # x tile: full-extent (unpadded) feature axis, cast happens in-kernel.
                pl.BlockSpec((tile_b, in_size), lambda i: (i, 0)),
                pl.BlockSpec((in_size, hid_p), lambda i: (0, 0), pipeline_mode=single),  # W1
                pl.BlockSpec((1, hid_p), lambda i: (0, 0), pipeline_mode=single),        # b1
                pl.BlockSpec((hid_p, hid_p), lambda i: (0, 0), pipeline_mode=single),    # W2
                pl.BlockSpec((1, hid_p), lambda i: (0, 0), pipeline_mode=single),        # b2
                pl.BlockSpec((1, hid_p), lambda i: (0, 0), pipeline_mode=single),        # W3 row
                pl.BlockSpec((1, 1), lambda i: (0, 0), pipeline_mode=single),            # b3
            ],
            out_specs=pl.BlockSpec((1, 1, tile_b), lambda i: (i, 0, 0)),
        ),
        compiler_params=pltpu.CompilerParams(
            dimension_semantics=("parallel",), vmem_limit_bytes=vmem_limit),
    )(x2d, w1, b1, w2, b2, w3, b3)

    # squeeze(-1): flatten the compact per-tile rows and drop any ragged-tile tail.
    return out.reshape(-1)[:B].reshape(lead)


def reference_forward(x, params, *, compute_dtype=jnp.float32):
    """Pure-JAX reference mirroring the kernel's cast behavior."""
    w1, b1, w2, b2, w3, b3 = params
    h1 = jax.nn.relu(
        jnp.dot(x.astype(compute_dtype), w1.astype(compute_dtype),
                preferred_element_type=jnp.float32) + jnp.reshape(b1, (1, -1)))
    h2 = jax.nn.relu(
        jnp.dot(h1.astype(compute_dtype), w2.astype(compute_dtype),
                preferred_element_type=jnp.float32) + jnp.reshape(b2, (1, -1)))
    v = jnp.dot(h2, jnp.reshape(w3, (-1, 1)).astype(jnp.float32),
                preferred_element_type=jnp.float32) + jnp.reshape(b3, (1, 1))
    return v[:, 0]


if __name__ == "__main__":
    key = jax.random.PRNGKey(0)
    kx, kp, kx2, kp2 = jax.random.split(key, 4)

    # --- Small correctness check: f32 compute path, tight tolerance, single grid step ---
    batch, input_size, hidden_size = 8, 32, 32
    x = jax.random.normal(kx, (batch, input_size), jnp.float32)
    params = init_params(kp, input_size, hidden_size)

    prep_f32 = prepare_params(params, compute_dtype=jnp.float32)
    out = jax.block_until_ready(simple_value_network(x, prep_f32))
    ref = reference_forward(x, params, compute_dtype=jnp.float32)
    assert out.shape == (batch,), out.shape
    assert jnp.allclose(out, ref, atol=1e-4, rtol=1e-4), (out, ref)

    # --- Multi-step grid + bf16 MXU path (realistic batch: 2 steps on 1-TC chips,
    #     4 steps on 2-TC chips; compact lane-dense output either way) ---
    batch2, input2, hidden2 = 1024, 32, 128
    x2 = jax.random.normal(kx2, (batch2, input2), jnp.float32)
    params2 = init_params(kp2, input2, hidden2)
    prep_bf16 = prepare_params(params2, compute_dtype=jnp.bfloat16)
    out2 = jax.block_until_ready(simple_value_network(x2, prep_bf16))
    ref2 = reference_forward(x2, params2, compute_dtype=jnp.bfloat16)
    assert out2.shape == (batch2,), out2.shape
    assert jnp.allclose(out2, ref2, atol=5e-2, rtol=5e-2), float(jnp.max(jnp.abs(out2 - ref2)))

    print("KERNEL_OK")
</pallas_src>

<mosaic_0001>
module attributes {stable_mosaic.version = 11 : i64} {
  func.func @value_net_kernel(%arg0: i32, %arg1: memref<8x32xf32, #tpu.memory_space<vmem>>, %arg2: memref<32x128xf32, #tpu.memory_space<vmem>>, %arg3: memref<1x128xf32, #tpu.memory_space<vmem>>, %arg4: memref<128x128xf32, #tpu.memory_space<vmem>>, %arg5: memref<1x128xf32, #tpu.memory_space<vmem>>, %arg6: memref<1x128xf32, #tpu.memory_space<vmem>>, %arg7: memref<1x1xf32, #tpu.memory_space<vmem>>, %arg8: memref<1x1x8xf32, #tpu.memory_space<vmem>>) attributes {dimension_semantics = [#tpu.dimension_semantics<parallel>], iteration_bounds = array<i64: 1>, scalar_prefetch = 0 : i64, scratch_operands = 0 : i64, tpu.core_type = #tpu.core_type<tc>, window_params = [{transform_indices = @transform_0, window_bounds = array<i64: 8, 32>}, {pipeline_mode = #tpu.pipeline_mode<synchronous>, transform_indices = @transform_1, window_bounds = array<i64: 32, 128>}, {pipeline_mode = #tpu.pipeline_mode<synchronous>, transform_indices = @transform_2, window_bounds = array<i64: 1, 128>}, {pipeline_mode = #tpu.pipeline_mode<synchronous>, transform_indices = @transform_3, window_bounds = array<i64: 128, 128>}, {pipeline_mode = #tpu.pipeline_mode<synchronous>, transform_indices = @transform_4, window_bounds = array<i64: 1, 128>}, {pipeline_mode = #tpu.pipeline_mode<synchronous>, transform_indices = @transform_5, window_bounds = array<i64: 1, 128>}, {pipeline_mode = #tpu.pipeline_mode<synchronous>, transform_indices = @transform_6, window_bounds = array<i64: 1, 1>}, {transform_indices = @transform_7, window_bounds = array<i64: 1, 1, 8>}]} {
    %c0 = arith.constant 0 : index
    %c0_0 = arith.constant 0 : index
    %0 = vector.load %arg1[%c0, %c0_0] : memref<8x32xf32, #tpu.memory_space<vmem>>, vector<8x32xf32>
    %c0_1 = arith.constant 0 : index
    %c0_2 = arith.constant 0 : index
    %1 = vector.load %arg2[%c0_1, %c0_2] : memref<32x128xf32, #tpu.memory_space<vmem>>, vector<32x128xf32>
    %cst = arith.constant dense<0.000000e+00> : vector<8x128xf32>
    %2 = tpu.matmul %0, %1, %cst {dimension_numbers = #tpu.dot_dimension_numbers<[1], [0], [0], [1], [0, 0, 1, 1], [], []>} : vector<8x32xf32>, vector<32x128xf32>, vector<8x128xf32> -> vector<8x128xf32>
    %c0_3 = arith.constant 0 : index
    %c0_4 = arith.constant 0 : index
    %3 = vector.load %arg3[%c0_3, %c0_4] : memref<1x128xf32, #tpu.memory_space<vmem>>, vector<1x128xf32>
    %4 = vector.broadcast %3 : vector<1x128xf32> to vector<8x128xf32>
    %5 = arith.addf %2, %4 : vector<8x128xf32>
    %cst_5 = arith.constant 0.000000e+00 : f32
    %6 = vector.broadcast %cst_5 : f32 to vector<8x128xf32>
    %7 = arith.maximumf %5, %6 : vector<8x128xf32>
    %c0_6 = arith.constant 0 : index
    %c0_7 = arith.constant 0 : index
    %8 = vector.load %arg4[%c0_6, %c0_7] : memref<128x128xf32, #tpu.memory_space<vmem>>, vector<128x128xf32>
    %cst_8 = arith.constant dense<0.000000e+00> : vector<8x128xf32>
    %9 = tpu.matmul %7, %8, %cst_8 {dimension_numbers = #tpu.dot_dimension_numbers<[1], [0], [0], [1], [0, 0, 1, 1], [], []>} : vector<8x128xf32>, vector<128x128xf32>, vector<8x128xf32> -> vector<8x128xf32>
    %c0_9 = arith.constant 0 : index
    %c0_10 = arith.constant 0 : index
    %10 = vector.load %arg5[%c0_9, %c0_10] : memref<1x128xf32, #tpu.memory_space<vmem>>, vector<1x128xf32>
    %11 = vector.broadcast %10 : vector<1x128xf32> to vector<8x128xf32>
    %12 = arith.addf %9, %11 : vector<8x128xf32>
    %cst_11 = arith.constant 0.000000e+00 : f32
    %13 = vector.broadcast %cst_11 : f32 to vector<8x128xf32>
    %14 = arith.maximumf %12, %13 : vector<8x128xf32>
    %c0_12 = arith.constant 0 : index
    %c0_13 = arith.constant 0 : index
    %15 = vector.load %arg6[%c0_12, %c0_13] : memref<1x128xf32, #tpu.memory_space<vmem>>, vector<1x128xf32>
    %16 = vector.broadcast %15 : vector<1x128xf32> to vector<8x128xf32>
    %17 = arith.mulf %14, %16 : vector<8x128xf32>
    %cst_14 = arith.constant dense<0.000000e+00> : vector<8xf32>
    %18 = vector.multi_reduction <add>, %17, %cst_14 [1] : vector<8x128xf32> to vector<8xf32>
    %19 = vector.shape_cast %18 : vector<8xf32> to vector<8x1xf32>
    %c0_15 = arith.constant 0 : index
    %c0_16 = arith.constant 0 : index
    %20 = vector.load %arg7[%c0_15, %c0_16] : memref<1x1xf32, #tpu.memory_space<vmem>>, vector<1x1xf32>
    %21 = vector.broadcast %20 : vector<1x1xf32> to vector<8x1xf32>
    %22 = arith.addf %19, %21 : vector<8x1xf32>
    %23 = tpu.transpose %22, [1, 0] : vector<8x1xf32> -> vector<1x8xf32>
    %24 = vector.shape_cast %23 : vector<1x8xf32> to vector<1x1x8xf32>
    %c0_17 = arith.constant 0 : index
    %c0_18 = arith.constant 0 : index
    %c0_19 = arith.constant 0 : index
    %25 = vector.load %arg8[%c0_17, %c0_18, %c0_19] : memref<1x1x8xf32, #tpu.memory_space<vmem>>, vector<1x1x8xf32>
    tpu.vector_store %arg8[%c0_17, %c0_18, %c0_19], %24 {strides = array<i32>} : memref<1x1x8xf32, #tpu.memory_space<vmem>>, vector<1x1x8xf32>,
    return
  }
  func.func @transform_0(%arg0: i32) -> (i32, i32) {
    %c0_i32 = arith.constant 0 : i32
    %c0_i32_0 = arith.constant 0 : i32
    return %arg0, %c0_i32 : i32, i32
  }
  func.func @transform_1(%arg0: i32) -> (i32, i32) {
    %c0_i32 = arith.constant 0 : i32
    %c0_i32_0 = arith.constant 0 : i32
    %c0_i32_1 = arith.constant 0 : i32
    return %c0_i32, %c0_i32_0 : i32, i32
  }
  func.func @transform_2(%arg0: i32) -> (i32, i32) {
    %c0_i32 = arith.constant 0 : i32
    %c0_i32_0 = arith.constant 0 : i32
    %c0_i32_1 = arith.constant 0 : i32
    return %c0_i32, %c0_i32_0 : i32, i32
  }
  func.func @transform_3(%arg0: i32) -> (i32, i32) {
    %c0_i32 = arith.constant 0 : i32
    %c0_i32_0 = arith.constant 0 : i32
    %c0_i32_1 = arith.constant 0 : i32
    return %c0_i32, %c0_i32_0 : i32, i32
  }
  func.func @transform_4(%arg0: i32) -> (i32, i32) {
    %c0_i32 = arith.constant 0 : i32
    %c0_i32_0 = arith.constant 0 : i32
    %c0_i32_1 = arith.constant 0 : i32
    return %c0_i32, %c0_i32_0 : i32, i32
  }
  func.func @transform_5(%arg0: i32) -> (i32, i32) {
    %c0_i32 = arith.constant 0 : i32
    %c0_i32_0 = arith.constant 0 : i32
    %c0_i32_1 = arith.constant 0 : i32
    return %c0_i32, %c0_i32_0 : i32, i32
  }
  func.func @transform_6(%arg0: i32) -> (i32, i32) {
    %c0_i32 = arith.constant 0 : i32
    %c0_i32_0 = arith.constant 0 : i32
    %c0_i32_1 = arith.constant 0 : i32
    return %c0_i32, %c0_i32_0 : i32, i32
  }
  func.func @transform_7(%arg0: i32) -> (i32, i32, i32) {
    %c0_i32 = arith.constant 0 : i32
    %c0_i32_0 = arith.constant 0 : i32
    %c0_i32_1 = arith.constant 0 : i32
    return %arg0, %c0_i32, %c0_i32_0 : i32, i32, i32
  }
}

</mosaic_0001>

<bundles_post_ra>
// kernel: tpu_custom_call.1
= control target key start
LH: loop header
LB: loop body
LE: loop exit
PB: predicated region body
PF: predicated region fallthrough
CT: control target
= control target key end

     0   :  { %s638_s0 = inlined_call_operand.hbm [shape: f32[8,32], index: 0, kind: input, shape index: {}]   ;;  %s639_s1 = inlined_call_operand.hbm [shape: f32[32,128], index: 1, kind: input, shape index: {}]   ;;  %s640_s2 = inlined_call_operand.vmem [shape: f32[1,128], index: 2, kind: input, shape index: {}]   ;;  %s641_s3 = inlined_call_operand.hbm [shape: f32[128,128], index: 3, kind: input, shape index: {}]   ;;  %s642_s4 = inlined_call_operand.vmem [shape: f32[1,128], index: 4, kind: input, shape index: {}]   ;;  %s643_s5 = inlined_call_operand.vmem [shape: f32[1,128], index: 5, kind: input, shape index: {}]   ;;  %s644_s6 = inlined_call_operand.<no memory space> [shape: f32[1,1], index: 6, kind: input, shape index: {}]   ;;  %s645_s7 = inlined_call_operand.hbm [shape: f32[1,1,8], index: 7, kind: output, shape index: {}]  }
   0x1   :  { %v12_v0 = vstv %s644_s6 }
   0x2   :  { %13 = vst [vmem:[#allocation2] sm:$0x1] %v12_v0 }
   0x3   :  { %14 = vsyncpa [#allocation4], 0 }
   0x4   :  { %15 = vsyncpa [#allocation7], 0 }
   0x5   :  { %16 = vsyncpa [#allocation5], 0  ;;  %s523_s26 = smov [#allocation6]   ;;  %s429_s30 = scalar_lea.hbm %s639_s1, 512 }
   0x6   :  { %s32_s27 = sshll.u32 %s523_s26, 4  ;;  %p430_p0 = scmp.ne.s32.totalorder %s639_s1, %s429_s30  ;;  %s33_s27 = int_to_ptr.vmem [resolvable:$true] %s32_s27 }
   0x7   :  { %p433_p1 = scmp.lt.u32.totalorder %s429_s30, %s639_s1 }
   0x9   :  { %p435_p2 = pnand %p433_p1, %p430_p0 }
   0xb   :  { %438 = shalt.err (!%p435_p2)
}
   0xc   :  { %s439_s6 = scalar_lea.vmem %s33_s27, 512  ;;  %p444_p4 = scmp.lt.s32.totalorder %s33_s27, %s33_s27 }
   0xd   :  { %p440_p3 = scmp.ne.s32.totalorder %s33_s27, %s439_s6  ;;  %p445_p5 = scmp.lt.s32.totalorder %s439_s6, %s439_s6 }
   0xf   :  { %p446_p6 = por %p445_p5, %p444_p4 }
  0x11   :  { %p447_p7 = pnand %p446_p6, %p440_p3 }
  0x13   :  { %450 = shalt.err (!%p447_p7)
}
  0x14   :  { %s524_s12 = smov 128   ;;  %s525_s13 = smov 8  }
  0x15   :  { %38 = dma.hbm_to_vmem [thread:$0]  %s639_s1, 512, %s33_s27, [#allocation7], %s524_s12, %s524_s12, %s525_s13  }
  0x16   :  { %s526_s16 = smov [#allocation3]   ;;  %s527_s18 = smov [#allocation8]  }
  0x17   :  { %s23_s17 = sshll.u32 %s526_s16, 4  ;;  %s46_s19 = sshll.u32 %s527_s18, 4  ;;  %s24_s17 = int_to_ptr.vmem [resolvable:$true] %s23_s17  ;;  %s47_s19 = int_to_ptr.vmem [resolvable:$true] %s46_s19 }
  0x18   :  { %s451_s22 = scalar_lea.hbm %s638_s0, 128 }
  0x19   :  { %p452_p8 = scmp.ne.s32.totalorder %s638_s0, %s451_s22  ;;  %p455_p9 = scmp.lt.u32.totalorder %s451_s22, %s638_s0 }
  0x1b   :  { %p457_p10 = pnand %p455_p9, %p452_p8 }
  0x1d   :  { %460 = shalt.err (!%p457_p10)
}
  0x1e   :  { %s461_s1 = scalar_lea.vmem %s24_s17, 128  ;;  %p466_p12 = scmp.lt.s32.totalorder %s24_s17, %s24_s17 }
  0x1f   :  { %p462_p11 = scmp.ne.s32.totalorder %s24_s17, %s461_s1  ;;  %p467_p13 = scmp.lt.s32.totalorder %s461_s1, %s461_s1 }
  0x21   :  { %p468_p0 = por %p467_p13, %p466_p12 }
  0x23   :  { %p469_p1 = pnand %p468_p0, %p462_p11 }
  0x25   :  { %472 = shalt.err (!%p469_p1)
}
  0x26   :  { %26 = dma.hbm_to_vmem [thread:$0]  %s638_s0, 128, %s24_s17, [#allocation4]  }
  0x27   :  { %s473_s8 = scalar_lea.hbm %s641_s3, 2048 }
  0x28   :  { %p474_p2 = scmp.ne.s32.totalorder %s641_s3, %s473_s8  ;;  %p477_p3 = scmp.lt.u32.totalorder %s473_s8, %s641_s3 }
  0x2a   :  { %p479_p4 = pnand %p477_p3, %p474_p2 }
  0x2c   :  { %482 = shalt.err (!%p479_p4)
}
  0x2d   :  { %s483_s14 = scalar_lea.vmem %s47_s19, 2048  ;;  %p488_p6 = scmp.lt.s32.totalorder %s47_s19, %s47_s19 }
  0x2e   :  { %p484_p5 = scmp.ne.s32.totalorder %s47_s19, %s483_s14  ;;  %p489_p7 = scmp.lt.s32.totalorder %s483_s14, %s483_s14 }
  0x30   :  { %p490_p8 = por %p489_p7, %p488_p6 }
  0x32   :  { %p491_p9 = pnand %p490_p8, %p484_p5 }
  0x34   :  { %494 = shalt.err (!%p491_p9)
}
  0x35   :  { %52 = dma.hbm_to_vmem [thread:$0]  %s641_s3, 2048, %s47_s19, [#allocation7], %s524_s12, %s524_s12, %s525_s13  }
  0x36   :  { %517 = dma.done.wait [#allocation4], 128  }
  0x37   :  { %518 = vsyncadd [#allocation4], 4294967168 }
  0x38   :  { %519 = dma.done.wait [#allocation7], 2560  }
  0x39   :  { %520 = vsyncadd [#allocation7], 4294964736  ;;  %v528_v1 = vmov 0.0|0.0   ;;  %vm529_vm0 = vmmov 0   ;;  %v530_v2 = vmov 0.0   ;;  %v69_v3 = vld [vmem:[#allocation6] sm:$0xff] }
  0x3a   :  { %390 = vmatprep.subr.bf16.mxu0 %v528_v1  ;;  %352 = vmatprep.mubr.msk.f32.mxu0 %vm529_vm0, %v530_v2  ;;  %v70_v4 = vld [vmem:[#allocation6 + $0x8] sm:$0xff]  ;;  %v71_v5 = vld [vmem:[#allocation6 + $0x10] sm:$0xff]  ;;  %v72_v7 = vld [vmem:[#allocation6 + $0x18] sm:$0xff]  ;;  %vm80_vm1 = vcmask 261120   ;;  %vm299_vm2 = vcmask 57344  }
  0x3b   :  { %396 = vmatprep.subr.bf16.mxu1 %v528_v1  ;;  %387 = vmatprep.mubr.msk.f32.mxu1 %vm529_vm0, %v530_v2  ;;  %v391_v6 = vpack.c.bf16 %v70_v4, %v69_v3  ;;  %v155_v8 = vld [vmem:[#allocation8] sm:$0xff]  ;;  %v156_v9 = vld [vmem:[#allocation8 + $0x8] sm:$0xff]  ;;  %v157_v10 = vld [vmem:[#allocation8 + $0x10] sm:$0xff]  ;;  %v394_v12 = vpack.c.bf16 %v72_v7, %v71_v5 }
  0x3c   :  { %v158_v11 = vld [vmem:[#allocation8 + $0x18] sm:$0xff]  ;;  %v397_v13 = vpack.c.bf16 %v156_v9, %v155_v8  ;;  %v159_v15 = vld [vmem:[#allocation8 + $0x20] sm:$0xff]  ;;  %v160_v16 = vld [vmem:[#allocation8 + $0x28] sm:$0xff] }
  0x3d   :  { %392 = vmatpush3.bf16.msra.mxu0 %v391_v6  ;;  %v400_v14 = vpack.c.bf16 %v158_v11, %v157_v10  ;;  %v68_v17 = vld [vmem:[#allocation3] sm:$0xff]  ;;  %v403_v18 = vpack.c.bf16 %v160_v16, %v159_v15  ;;  %v161_v19 = vld [vmem:[#allocation8 + $0x30] sm:$0xff]  ;;  %v163_v22 = vld [vmem:[#allocation8 + $0x40] sm:$0xff] }
  0x3e   :  { %393 = vmatprep.subr.bf16.mxu0 %v528_v1  ;;  %398 = vmatpush3.bf16.msra.mxu1 %v397_v13  ;;  %v162_v20 = vld [vmem:[#allocation8 + $0x38] sm:$0xff]  ;;  %v164_v23 = vld [vmem:[#allocation8 + $0x48] sm:$0xff]  ;;  %v165_v25 = vld [vmem:[#allocation8 + $0x50] sm:$0xff] }
  0x3f   :  { %399 = vmatprep.subr.bf16.mxu1 %v528_v1  ;;  %v406_v21 = vpack.c.bf16 %v162_v20, %v161_v19  ;;  %v409_v24 = vpack.c.bf16 %v164_v23, %v163_v22  ;;  %v166_v26 = vld [vmem:[#allocation8 + $0x58] sm:$0xff]  ;;  %v167_v28 = vld [vmem:[#allocation8 + $0x60] sm:$0xff]  ;;  %v168_v29 = vld [vmem:[#allocation8 + $0x68] sm:$0xff] }
  0x40   :  { %v412_v27 = vpack.c.bf16 %v166_v26, %v165_v25  ;;  %v415_v30 = vpack.c.bf16 %v168_v29, %v167_v28  ;;  %v169_v31 = vld [vmem:[#allocation8 + $0x70] sm:$0xff]  ;;  %v170_v32 = vld [vmem:[#allocation8 + $0x78] sm:$0xff] }
  0x41   :  { %395 = vmatpush3.bf16.msra.mxu0 %v394_v12  ;;  %v418_v33 = vpack.c.bf16 %v170_v32, %v169_v31  ;;  %v317_v34 = vld [vmem:[%s640_s2] ss:$0 sm:$0xff]  ;;  %s531_s2 = smov [#allocation9]  }
  0x42   :  { %401 = vmatpush3.bf16.msra.mxu1 %v400_v14  ;;  %v319_v39 = vld [vmem:[%s642_s4] ss:$0 sm:$0xff]  ;;  %s307_s19 = sshll.u32 %s531_s2, 4  ;;  %s308_s19 = int_to_ptr.vmem [resolvable:$true] %s307_s19 }
  0x43   :  { %402 = vmatprep.subr.bf16.mxu1 %v528_v1  ;;  %v320_v43 = vld [vmem:[%s643_s5] ss:$0 sm:$0xff]  ;;  %s495_s4 = scalar_lea.vmem %s308_s19, 16  ;;  %s499_s20 = scalar_lea.vmem %s308_s19, 32 }
  0x44   :  { %353 = vmatmul.mubr.msk.f32.vlgmr.msra.gmra.mrb[0].mxu0 %vm80_vm1, %v68_v17  ;;  %v321_v46 = vld [vmem:[#allocation2] ss:$0 sm:$0xff]  ;;  %p496_p10 = scmp.ne.s32.totalorder %s308_s19, %s495_s4  ;;  %p500_p11 = scmp.lt.s32.totalorder %s308_s19, %s308_s19 }
  0x45   :  { %p501_p12 = scmp.lt.s32.totalorder %s499_s20, %s495_s4 }
  0x46   :  { %404 = vmatpush3.bf16.msra.mxu1 %v403_v18 }
  0x47   :  { %405 = vmatprep.subr.bf16.mxu1 %v528_v1  ;;  %p502_p13 = por %p501_p12, %p500_p11 }
  0x49   :  { %p503_p0 = pnand %p502_p13, %p496_p10 }
  0x4a   :  { %407 = vmatpush3.bf16.msra.mxu1 %v406_v21 }
  0x4b   :  { %408 = vmatprep.subr.bf16.mxu1 %v528_v1 }
  0x4e   :  { %410 = vmatpush3.bf16.msra.mxu1 %v409_v24 }
  0x4f   :  { %411 = vmatprep.subr.bf16.mxu1 %v528_v1 }
  0x52   :  { %413 = vmatpush3.bf16.msra.mxu1 %v412_v27 }
  0x53   :  { %414 = vmatprep.subr.bf16.mxu1 %v528_v1 }
  0x56   :  { %416 = vmatpush3.bf16.msra.mxu1 %v415_v30 }
  0x57   :  { %417 = vmatprep.subr.bf16.mxu1 %v528_v1 }
  0x5a   :  { %419 = vmatpush3.bf16.msra.mxu1 %v418_v33 }
 0x117   :  { %v150_v35 = vpop.f32.mrb[0].mxu0 }
 0x118   :  { %v151_v36 = vadd.f32 %v317_v34, %v150_v35  ;;  %v354_v37 = vpop.f32.mrb[1].mxu0 }
 0x11a   :  { %v154_v38 = vmax.f32 %v151_v36, 0.0 }
 0x11c   :  { %388 = vmatmul.mubr.f32.vlgmr.msra.gmra.mrb[0].mxu1 %v154_v38 }
 0x1ef   :  { %v244_v40 = vpop.f32.mrb[0].mxu1 }
 0x1f0   :  { %v245_v41 = vadd.f32 %v319_v39, %v244_v40  ;;  %v389_v42 = vpop.f32.mrb[1].mxu1 }
 0x1f2   :  { %v248_v44 = vmax.f32 %v245_v41, 0.0 }
 0x1f4   :  { %v256_v45 = vmul.f32 %v320_v43, %v248_v44 }
 0x1f6   :  { %257 = vadd.xlane.f32.xlu0 %v256_v45 }
 0x283   :  { %v258_v47 = vpop.xlane.xlu0 %257 }
 0x284   :  { %v266_v48 = vadd.f32 %v321_v46, %v258_v47 }
 0x286   :  { %267 = vxpose.xlu0.b32.start.end [1/1] (short) (narrow) %v266_v48, 8 }
 0x306   :  { %v283_v49 = vpop.trf.xlu0 }
 0x307   :  { %300 = vst.msk [vmem:[#allocation9] sm:$0x1] %vm299_vm2, %v283_v49 }
 0x308   :  { %506 = shalt.err (!%p503_p0)
}
 0x309   :  { %s507_s22 = scalar_lea.hbm %s645_s7, 16 }
 0x30a   :  { %p508_p1 = scmp.ne.s32.totalorder %s645_s7, %s507_s22  ;;  %p511_p2 = scmp.lt.u32.totalorder %s507_s22, %s645_s7 }
 0x30c   :  { %p513_p3 = pnand %p511_p2, %p508_p1 }
 0x30e   :  { %516 = shalt.err (!%p513_p3)
}
 0x30f   :  { %310 = dma.vmem_to_hbm [thread:$0]  %s308_s19, 16, %s645_s7, [#allocation5]  }
 0x310   :  { %521 = dma.done.wait [#allocation5], 16  }
 0x311   :  { %522 = vsyncadd [#allocation5], 4294967280 }
 0x312   :  { %314 = vsyncpa [#allocation4], 1 }
 0x313   :  { %315 = vsyncpa [#allocation7], 1 }
 0x314   :  { %316 = vsyncpa [#allocation5], 1 }

</bundles_post_ra>
